<compile_context>
chip_gen: v7x
topology: tpu7x:2x2x1
jax: 0.10.0
libtpu: 0.0.40
codegen_flags: <defaults>
</compile_context>

<pallas_src>
import jax
import jax.numpy as jnp
from jax.experimental import pallas as pl
from jax.experimental.pallas import tpu as pltpu

LAYERS = [4, 40, 40, 40, 40, 40, 20, 1]
DEPTH = len(LAYERS) - 1            # 7 linear layers, tanh after the first 6
F_IN = LAYERS[0]                   # 4

CHUNK = 512                        # lane width of one inner compute chunk
ROW_STRIDE = 40                    # rows reserved per layer in the packed blocks

# wpack: (240, 40) -- W_T (f_out, f_in) for the 6 tanh layers; layer 0 carries
#                     its bias in column 4 (multiplied against the ones row).
W_ROWS = (DEPTH - 1) * ROW_STRIDE  # 240
W_COLS = 40

# bpack: (264, CHUNK) -- pre-broadcast biases for layers 1..5 at rows
#   [40*li, 40*li+f_out); final-layer weight column at rows [240, 260);
#   final-layer bias at row 260.  All reads of it are full-lane loads.
FINAL_W_ROW = (DEPTH - 1) * ROW_STRIDE       # 240
FINAL_B_ROW = FINAL_W_ROW + LAYERS[-2]       # 260
B_ROWS = 264                                 # multiple of 8


def _make_kernel(slab_chunks, compute_dtype):
    """Kernel closure: one grid step processes `slab_chunks` 512-lane chunks."""

    def kernel(wpack_ref, bpack_ref, x_ref, out_ref):
        # ---- Hoisted ONCE per grid step: weight tiles for all 6 tanh layers ----
        # (any masked-load / relayout cost happens once per step, not per chunk)
        ws = []
        for li in range(DEPTH - 1):
            f_in = (F_IN + 1) if li == 0 else LAYERS[li]    # layer 0: +1 bias col
            f_out = LAYERS[li + 1]
            r0 = li * ROW_STRIDE
            ws.append(wpack_ref[r0:r0 + f_out, 0:f_in].astype(compute_dtype))

        # ---- Inner static loop over 512-lane batch chunks of this slab ----
        for c in range(slab_chunks):
            c0 = c * CHUNK
            xc = x_ref[:, c0:c0 + CHUNK]            # (5, CHUNK): 4 features + ones row

            # Layer 0: bias folded into the matmul via the ones row -> no bias add.
            h = jnp.tanh(jnp.dot(ws[0], xc.astype(compute_dtype),
                                 preferred_element_type=jnp.float32))

            # Layers 1..5: MXU matmul + full-lane pre-broadcast bias + EUP tanh.
            for li in range(1, DEPTH - 1):
                f_out = LAYERS[li + 1]
                r0 = li * ROW_STRIDE
                h = jnp.dot(ws[li], h.astype(compute_dtype),
                            preferred_element_type=jnp.float32)
                h = jnp.tanh(h + bpack_ref[r0:r0 + f_out, :])

            # Final 20 -> 1 layer: VPU multiply + sublane (XLU) reduce.  The weight
            # column and bias are pre-broadcast across the chunk lanes, so there are
            # no 1-lane slices or broadcasts here either.
            wlast = bpack_ref[FINAL_W_ROW:FINAL_W_ROW + LAYERS[-2], :]   # (20, CHUNK)
            blast = bpack_ref[FINAL_B_ROW:FINAL_B_ROW + 1, :]            # (1, CHUNK)
            out_ref[:, c0:c0 + CHUNK] = (
                jnp.sum(wlast * h, axis=0, keepdims=True) + blast)

    return kernel


def _choose_slab_chunks(total_chunks, max_slab_chunks):
    """Pick chunks-per-slab: amortize per-grid-step overhead, keep >= 2 grid steps
    when possible (v7x has 2 TensorCores), and avoid excessive padded chunks
    (a fully padded chunk costs roughly 3x a grid step of overhead)."""
    if total_chunks <= 1:
        return 1
    smax = max(1, min(max_slab_chunks, total_chunks - 1))   # guarantees grid >= 2
    best_s, best_cost = 1, None
    for s in range(1, smax + 1):
        steps = -(-total_chunks // s)
        padded = steps * s - total_chunks
        cost = steps + 3 * padded
        if best_cost is None or cost <= best_cost:          # ties -> larger slab
            best_s, best_cost = s, cost
    return best_s


def dnn_forward(x, wpack, bpack, *, max_slab_chunks=4, compute_dtype=jnp.float32):
    """Run the MLP. x: (N, 4) float32 -> (N, 1) float32. Any N handled via padding."""
    n, f_in = x.shape
    assert f_in == F_IN

    total_chunks = -(-n // CHUNK)
    sc = _choose_slab_chunks(total_chunks, max_slab_chunks)
    grid = -(-total_chunks // sc)
    slab_m = sc * CHUNK
    n_pad = grid * slab_m

    # Single fused host-side prep: transpose to batch-on-lanes, zero-pad the batch
    # and append a ones row (folds layer-0's bias into its matmul).  Padded lanes
    # are per-lane independent and sliced off below.
    x_aug = (jnp.zeros((F_IN + 1, n_pad), jnp.float32)
             .at[:F_IN, :n].set(x.T.astype(jnp.float32))
             .at[F_IN, :].set(1.0))

    out_row = pl.pallas_call(
        _make_kernel(sc, compute_dtype),
        out_shape=jax.ShapeDtypeStruct((1, n_pad), jnp.float32),
        grid_spec=pltpu.PrefetchScalarGridSpec(
            num_scalar_prefetch=0,
            grid=(grid,),
            in_specs=[
                # Packed params: constant block index -> fetched once, VMEM-resident.
                pl.BlockSpec((W_ROWS, W_COLS), lambda i: (0, 0)),
                pl.BlockSpec((B_ROWS, CHUNK), lambda i: (0, 0)),
                # One batch slab (sc * CHUNK lanes) per grid step.
                pl.BlockSpec((F_IN + 1, slab_m), lambda i: (0, i)),
            ],
            out_specs=pl.BlockSpec((1, slab_m), lambda i: (0, i)),
        ),
        compiler_params=pltpu.CompilerParams(
            dimension_semantics=("parallel",)),
    )(wpack, bpack, x_aug)

    # Drop padded lanes; return in the original (N, 1) convention.
    return out_row[0, :n][:, None]


def init_params(key):
    """PyTorch-style Linear init: U(-1/sqrt(fan_in), 1/sqrt(fan_in)).
    Weights kept in torch layout: W_T of shape (f_out, f_in), bias (f_out,)."""
    params = []
    for li in range(DEPTH):
        fan_in, fan_out = LAYERS[li], LAYERS[li + 1]
        key, kw, kb = jax.random.split(key, 3)
        bound = 1.0 / jnp.sqrt(fan_in)
        wt = jax.random.uniform(kw, (fan_out, fan_in), jnp.float32, -bound, bound)
        b = jax.random.uniform(kb, (fan_out,), jnp.float32, -bound, bound)
        params.append((wt, b))
    return params


def pack_params(params):
    """Pack all parameters into the two blocks the kernel expects (see layout above)."""
    wpack = jnp.zeros((W_ROWS, W_COLS), jnp.float32)
    bpack = jnp.zeros((B_ROWS, CHUNK), jnp.float32)
    for li, (wt, b) in enumerate(params):
        f_out, f_in = wt.shape
        r0 = li * ROW_STRIDE
        if li == 0:
            wpack = wpack.at[r0:r0 + f_out, 0:f_in].set(wt)
            wpack = wpack.at[r0:r0 + f_out, f_in].set(b)       # bias column (col 4)
        elif li < DEPTH - 1:
            wpack = wpack.at[r0:r0 + f_out, 0:f_in].set(wt)
            bpack = bpack.at[r0:r0 + f_out, :].set(
                jnp.broadcast_to(b[:, None], (f_out, CHUNK)))
        else:  # final 20 -> 1 layer: pre-broadcast weight rows + scalar bias row
            bpack = bpack.at[FINAL_W_ROW:FINAL_W_ROW + f_in, :].set(
                jnp.broadcast_to(wt[0, :, None], (f_in, CHUNK)))
            bpack = bpack.at[FINAL_B_ROW, :].set(b[0])
    return wpack, bpack


def dnn_ref(x, params):
    """Pure-JAX reference mirroring torch.nn.Linear (x @ W.T + b) + Tanh stack."""
    h = x
    for li, (wt, b) in enumerate(params):
        h = h @ wt.T + b
        if li < DEPTH - 1:
            h = jnp.tanh(h)
    return h


if __name__ == "__main__":
    key = jax.random.PRNGKey(0)
    kx1, kx2, kp = jax.random.split(key, 3)

    params = init_params(kp)
    wpack, bpack = pack_params(params)

    # Two deterministic cases:
    #  - small batch (single chunk / single grid step, exercises padding)
    #  - larger batch (8 chunks -> slab of 4 chunks, grid of 2 parallel steps)
    for n, kx in ((200, kx1), (4096, kx2)):
        x = jax.random.uniform(kx, (n, F_IN), jnp.float32, -1.0, 1.0)
        out = jax.block_until_ready(dnn_forward(x, wpack, bpack))
        ref = dnn_ref(x, params)
        assert out.shape == (n, 1)
        assert jnp.allclose(out, ref, atol=5e-5, rtol=1e-5), (
            f"mismatch vs JAX reference at n={n}: "
            f"max abs diff {float(jnp.max(jnp.abs(out - ref)))}")

    print("KERNEL_OK")
</pallas_src>

<mosaic_0001>
module attributes {stable_mosaic.version = 11 : i64} {
  func.func @kernel(%arg0: i32, %arg1: memref<240x40xf32, #tpu.memory_space<vmem>>, %arg2: memref<264x512xf32, #tpu.memory_space<vmem>>, %arg3: memref<5x512xf32, #tpu.memory_space<vmem>>, %arg4: memref<1x512xf32, #tpu.memory_space<vmem>>) attributes {dimension_semantics = [#tpu.dimension_semantics<parallel>], iteration_bounds = array<i64: 1>, scalar_prefetch = 0 : i64, scratch_operands = 0 : i64, tpu.core_type = #tpu.core_type<tc>, window_params = [{pipeline_mode = #tpu.pipeline_mode<synchronous>, transform_indices = @transform_0, window_bounds = array<i64: 240, 40>}, {pipeline_mode = #tpu.pipeline_mode<synchronous>, transform_indices = @transform_1, window_bounds = array<i64: 264, 512>}, {transform_indices = @transform_2, window_bounds = array<i64: 5, 512>}, {transform_indices = @transform_3, window_bounds = array<i64: 1, 512>}]} {
    %c0 = arith.constant 0 : index
    %c0_0 = arith.constant 0 : index
    %0 = vector.load %arg1[%c0, %c0_0] : memref<240x40xf32, #tpu.memory_space<vmem>>, vector<40x5xf32>
    %c40 = arith.constant 40 : index
    %c0_1 = arith.constant 0 : index
    %1 = vector.load %arg1[%c40, %c0_1] : memref<240x40xf32, #tpu.memory_space<vmem>>, vector<40x40xf32>
    %c80 = arith.constant 80 : index
    %c0_2 = arith.constant 0 : index
    %2 = vector.load %arg1[%c80, %c0_2] : memref<240x40xf32, #tpu.memory_space<vmem>>, vector<40x40xf32>
    %c120 = arith.constant 120 : index
    %c0_3 = arith.constant 0 : index
    %3 = vector.load %arg1[%c120, %c0_3] : memref<240x40xf32, #tpu.memory_space<vmem>>, vector<40x40xf32>
    %c160 = arith.constant 160 : index
    %c0_4 = arith.constant 0 : index
    %4 = vector.load %arg1[%c160, %c0_4] : memref<240x40xf32, #tpu.memory_space<vmem>>, vector<40x40xf32>
    %c200 = arith.constant 200 : index
    %c0_5 = arith.constant 0 : index
    %5 = vector.load %arg1[%c200, %c0_5] : memref<240x40xf32, #tpu.memory_space<vmem>>, vector<20x40xf32>
    %c0_6 = arith.constant 0 : index
    %c0_7 = arith.constant 0 : index
    %6 = vector.load %arg3[%c0_6, %c0_7] : memref<5x512xf32, #tpu.memory_space<vmem>>, vector<5x512xf32>
    %cst = arith.constant dense<0.000000e+00> : vector<40x512xf32>
    %7 = tpu.matmul %0, %6, %cst {dimension_numbers = #tpu.dot_dimension_numbers<[1], [0], [0], [1], [0, 0, 1, 1], [], []>} : vector<40x5xf32>, vector<5x512xf32>, vector<40x512xf32> -> vector<40x512xf32>
    %8 = math.tanh %7 : vector<40x512xf32>
    %cst_8 = arith.constant dense<0.000000e+00> : vector<40x512xf32>
    %9 = tpu.matmul %1, %8, %cst_8 {dimension_numbers = #tpu.dot_dimension_numbers<[1], [0], [0], [1], [0, 0, 1, 1], [], []>} : vector<40x40xf32>, vector<40x512xf32>, vector<40x512xf32> -> vector<40x512xf32>
    %c40_9 = arith.constant 40 : index
    %c0_10 = arith.constant 0 : index
    %10 = vector.load %arg2[%c40_9, %c0_10] : memref<264x512xf32, #tpu.memory_space<vmem>>, vector<40x512xf32>
    %11 = arith.addf %9, %10 : vector<40x512xf32>
    %12 = math.tanh %11 : vector<40x512xf32>
    %cst_11 = arith.constant dense<0.000000e+00> : vector<40x512xf32>
    %13 = tpu.matmul %2, %12, %cst_11 {dimension_numbers = #tpu.dot_dimension_numbers<[1], [0], [0], [1], [0, 0, 1, 1], [], []>} : vector<40x40xf32>, vector<40x512xf32>, vector<40x512xf32> -> vector<40x512xf32>
    %c80_12 = arith.constant 80 : index
    %c0_13 = arith.constant 0 : index
    %14 = vector.load %arg2[%c80_12, %c0_13] : memref<264x512xf32, #tpu.memory_space<vmem>>, vector<40x512xf32>
    %15 = arith.addf %13, %14 : vector<40x512xf32>
    %16 = math.tanh %15 : vector<40x512xf32>
    %cst_14 = arith.constant dense<0.000000e+00> : vector<40x512xf32>
    %17 = tpu.matmul %3, %16, %cst_14 {dimension_numbers = #tpu.dot_dimension_numbers<[1], [0], [0], [1], [0, 0, 1, 1], [], []>} : vector<40x40xf32>, vector<40x512xf32>, vector<40x512xf32> -> vector<40x512xf32>
    %c120_15 = arith.constant 120 : index
    %c0_16 = arith.constant 0 : index
    %18 = vector.load %arg2[%c120_15, %c0_16] : memref<264x512xf32, #tpu.memory_space<vmem>>, vector<40x512xf32>
    %19 = arith.addf %17, %18 : vector<40x512xf32>
    %20 = math.tanh %19 : vector<40x512xf32>
    %cst_17 = arith.constant dense<0.000000e+00> : vector<40x512xf32>
    %21 = tpu.matmul %4, %20, %cst_17 {dimension_numbers = #tpu.dot_dimension_numbers<[1], [0], [0], [1], [0, 0, 1, 1], [], []>} : vector<40x40xf32>, vector<40x512xf32>, vector<40x512xf32> -> vector<40x512xf32>
    %c160_18 = arith.constant 160 : index
    %c0_19 = arith.constant 0 : index
    %22 = vector.load %arg2[%c160_18, %c0_19] : memref<264x512xf32, #tpu.memory_space<vmem>>, vector<40x512xf32>
    %23 = arith.addf %21, %22 : vector<40x512xf32>
    %24 = math.tanh %23 : vector<40x512xf32>
    %cst_20 = arith.constant dense<0.000000e+00> : vector<20x512xf32>
    %25 = tpu.matmul %5, %24, %cst_20 {dimension_numbers = #tpu.dot_dimension_numbers<[1], [0], [0], [1], [0, 0, 1, 1], [], []>} : vector<20x40xf32>, vector<40x512xf32>, vector<20x512xf32> -> vector<20x512xf32>
    %c200_21 = arith.constant 200 : index
    %c0_22 = arith.constant 0 : index
    %26 = vector.load %arg2[%c200_21, %c0_22] : memref<264x512xf32, #tpu.memory_space<vmem>>, vector<20x512xf32>
    %27 = arith.addf %25, %26 : vector<20x512xf32>
    %28 = math.tanh %27 : vector<20x512xf32>
    %c240 = arith.constant 240 : index
    %c0_23 = arith.constant 0 : index
    %29 = vector.load %arg2[%c240, %c0_23] : memref<264x512xf32, #tpu.memory_space<vmem>>, vector<20x512xf32>
    %c260 = arith.constant 260 : index
    %c0_24 = arith.constant 0 : index
    %30 = vector.load %arg2[%c260, %c0_24] : memref<264x512xf32, #tpu.memory_space<vmem>>, vector<1x512xf32>
    %31 = arith.mulf %29, %28 : vector<20x512xf32>
    %cst_25 = arith.constant dense<0.000000e+00> : vector<512xf32>
    %32 = vector.multi_reduction <add>, %31, %cst_25 [0] : vector<20x512xf32> to vector<512xf32>
    %33 = vector.shape_cast %32 : vector<512xf32> to vector<1x512xf32>
    %34 = arith.addf %33, %30 : vector<1x512xf32>
    %c0_26 = arith.constant 0 : index
    %c0_27 = arith.constant 0 : index
    %35 = vector.load %arg4[%c0_26, %c0_27] : memref<1x512xf32, #tpu.memory_space<vmem>>, vector<1x512xf32>
    tpu.vector_store %arg4[%c0_26, %c0_27], %34 {strides = array<i32>} : memref<1x512xf32, #tpu.memory_space<vmem>>, vector<1x512xf32>,
    return
  }
  func.func @transform_0(%arg0: i32) -> (i32, i32) {
    %c0_i32 = arith.constant 0 : i32
    %c0_i32_0 = arith.constant 0 : i32
    %c0_i32_1 = arith.constant 0 : i32
    return %c0_i32, %c0_i32_0 : i32, i32
  }
  func.func @transform_1(%arg0: i32) -> (i32, i32) {
    %c0_i32 = arith.constant 0 : i32
    %c0_i32_0 = arith.constant 0 : i32
    %c0_i32_1 = arith.constant 0 : i32
    return %c0_i32, %c0_i32_0 : i32, i32
  }
  func.func @transform_2(%arg0: i32) -> (i32, i32) {
    %c0_i32 = arith.constant 0 : i32
    %c0_i32_0 = arith.constant 0 : i32
    return %c0_i32, %arg0 : i32, i32
  }
  func.func @transform_3(%arg0: i32) -> (i32, i32) {
    %c0_i32 = arith.constant 0 : i32
    %c0_i32_0 = arith.constant 0 : i32
    return %c0_i32, %arg0 : i32, i32
  }
}

</mosaic_0001>

<bundles_post_ra>
// kernel: tpu_custom_call.1
= control target key start
LH: loop header
LB: loop body
LE: loop exit
PB: predicated region body
PF: predicated region fallthrough
CT: control target
= control target key end

     0   :  { %8 = vsyncpa [#allocation3], 0  ;;  %s2297_s0 = inlined_call_operand.vmem [shape: f32[240,40], index: 0, kind: input, shape index: {}]   ;;  %s2298_s1 = inlined_call_operand.hbm [shape: f32[264,512], index: 1, kind: input, shape index: {}]   ;;  %s2299_s2 = inlined_call_operand.vmem [shape: f32[5,512], index: 2, kind: input, shape index: {}]   ;;  %s2300_s3 = inlined_call_operand.hbm [shape: f32[1,512], index: 3, kind: output, shape index: {}]  }
   0x1   :  { %9 = vsyncpa [#allocation4], 0  ;;  %s2035_s12 = smov [#allocation2]   ;;  %s1987_s16 = scalar_lea.hbm %s2298_s1, 16896 }
   0x2   :  { %s17_s13 = sshll.u32 %s2035_s12, 4  ;;  %p1988_p0 = scmp.ne.s32.totalorder %s2298_s1, %s1987_s16  ;;  %s18_s13 = int_to_ptr.vmem [resolvable:$true] %s17_s13 }
   0x3   :  { %p1991_p1 = scmp.lt.u32.totalorder %s1987_s16, %s2298_s1 }
   0x5   :  { %p1993_p2 = pnand %p1991_p1, %p1988_p0 }
   0x7   :  { %1996 = shalt.err (!%p1993_p2)
}
   0x8   :  { %s1997_s21 = scalar_lea.vmem %s18_s13, 16896  ;;  %p2002_p4 = scmp.lt.s32.totalorder %s18_s13, %s18_s13 }
   0x9   :  { %p1998_p3 = scmp.ne.s32.totalorder %s18_s13, %s1997_s21  ;;  %p2003_p5 = scmp.lt.s32.totalorder %s1997_s21, %s1997_s21 }
   0xb   :  { %p2004_p6 = por %p2003_p5, %p2002_p4 }
   0xd   :  { %p2005_p7 = pnand %p2004_p6, %p1998_p3 }
   0xf   :  { %2008 = shalt.err (!%p2005_p7)
}
  0x10   :  { %s2036_s22 = smov 512   ;;  %s2037_s23 = smov 32  }
  0x11   :  { %23 = dma.hbm_to_vmem [thread:$0]  %s2298_s1, 16896, %s18_s13, [#allocation3], %s2036_s22, %s2036_s22, %s2037_s23  }
  0x12   :  { %2031 = dma.done.wait [#allocation3], 16896  }
  0x13   :  { %2032 = vsyncadd [#allocation3], 4294950400  ;;  %v2038_v0 = vmov 0.0   ;;  %vm77_vm0 = vcmask 1044480   ;;  %vm61_vm1 = vcmask 39936   ;;  %v29_v5 = vld [vmem:[%s2297_s0] sm:$0xff] }
  0x14   :  { %154 = vmatprep.mubr.f32.mxu0 %v2038_v0  ;;  %249 = vmatprep.mubr.f32.mxu1 %v2038_v0  ;;  %v58_v1 = vld [vmem:[%s2299_s2 + $0x8] sm:$0x1f]  ;;  %v60_v2 = vld [vmem:[%s2299_s2 + $0x18] sm:$0x1f]  ;;  %v57_v3 = vld [vmem:[%s2299_s2] sm:$0x1f] }
  0x15   :  { %1617 = vmatprep.subr.msk.mxu0 %vm77_vm0, %v58_v1  ;;  %1624 = vmatprep.subr.msk.mxu1 %vm77_vm0, %v60_v2  ;;  %v59_v4 = vld [vmem:[%s2299_s2 + $0x10] sm:$0x1f]  ;;  %v30_v6 = vld [vmem:[%s2297_s0 + $0x8] sm:$0xff]  ;;  %v32_v8 = vld [vmem:[%s2297_s0 + $0x18] sm:$0xff]  ;;  %vm320_vm2 = vcmask 326656   ;;  %vm1507_vm3 = vcmask 1043456  }
  0x16   :  { %1618 = vmatpush1.msk.msra.mxu0 %vm77_vm0, %v57_v3  ;;  %1625 = vmatpush1.msk.msra.mxu1 %vm77_vm0, %v59_v4  ;;  %v31_v7 = vld [vmem:[%s2297_s0 + $0x10] sm:$0xff]  ;;  %v33_v9 = vld [vmem:[%s2297_s0 + $0x20] sm:$0xff]  ;;  %v34_v56 = vld [vmem:[%s2297_s0 + $0x28] sm:$0xff] }
  0x17   :  { %1619 = vmatmul.mubr.msk.f32.vlgmr.msra.gmra.mrb[0].mxu0 %vm61_vm1, %v29_v5  ;;  %1626 = vmatmul.mubr.msk.f32.vlgmr.msra.gmra.mrb[0].mxu1 %vm61_vm1, %v29_v5  ;;  %v35_v59 = vld [vmem:[%s2297_s0 + $0x30] sm:$0xff]  ;;  %v36_v60 = vld [vmem:[%s2297_s0 + $0x38] sm:$0xff]  ;;  %v37_v61 = vld [vmem:[%s2297_s0 + $0x40] sm:$0xff] }
  0x18   :  { %160 = vmatprep.mubr.f32.mxu0 %v2038_v0  ;;  %255 = vmatprep.mubr.f32.mxu1 %v2038_v0  ;;  %v38_v62 = vld [vmem:[%s2297_s0 + $0x48] sm:$0xff]  ;;  %v300_v63 = vld [vmem:[#allocation2 + $0xa0] sm:$0xff]  ;;  %v302_v1 = vld [vmem:[#allocation2 + $0xb0] sm:$0xff] }
  0x19   :  { %v301_v2 = vld [vmem:[#allocation2 + $0xa8] sm:$0xff]  ;;  %v303_v4 = vld [vmem:[#allocation2 + $0xb8] sm:$0xff] }
  0x1b   :  { %1620 = vmatmul.mubr.msk.f32.gmra.mrb[2].mxu0 %vm61_vm1, %v30_v6  ;;  %1627 = vmatmul.mubr.msk.f32.gmra.mrb[2].mxu1 %vm61_vm1, %v30_v6 }
  0x1c   :  { %166 = vmatprep.mubr.f32.mxu0 %v2038_v0  ;;  %261 = vmatprep.mubr.f32.mxu1 %v2038_v0 }
  0x1f   :  { %1621 = vmatmul.mubr.msk.f32.gmra.mrb[4].mxu0 %vm61_vm1, %v31_v7  ;;  %1628 = vmatmul.mubr.msk.f32.gmra.mrb[4].mxu1 %vm61_vm1, %v31_v7 }
  0x20   :  { %172 = vmatprep.mubr.f32.mxu0 %v2038_v0  ;;  %267 = vmatprep.mubr.f32.mxu1 %v2038_v0 }
  0x23   :  { %1622 = vmatmul.mubr.msk.f32.gmra.mrb[6].mxu0 %vm61_vm1, %v32_v8  ;;  %1629 = vmatmul.mubr.msk.f32.gmra.mrb[6].mxu1 %vm61_vm1, %v32_v8 }
  0x24   :  { %178 = vmatprep.mubr.f32.mxu0 %v2038_v0  ;;  %273 = vmatprep.mubr.f32.mxu1 %v2038_v0 }
  0x27   :  { %1623 = vmatmul.mubr.msk.f32.gmra.mrb[8].mxu0 %vm61_vm1, %v33_v9  ;;  %1630 = vmatmul.mubr.msk.f32.gmra.mrb[8].mxu1 %vm61_vm1, %v33_v9 }
  0x28   :  { %400 = vmatprep.mubr.f32.mxu0 %v2038_v0  ;;  %495 = vmatprep.mubr.f32.mxu1 %v2038_v0 }
  0xea   :  { %v156_v10 = vpop.f32.mrb[0].mxu0  ;;  %v251_v11 = vpop.f32.mrb[0].mxu1 }
  0xeb   :  { %1763 = vtanh.f32 %v156_v10  ;;  %v158_v12 = vpop.f32.mrb[1].mxu0  ;;  %v253_v13 = vpop.f32.mrb[1].mxu1 }
  0xec   :  { %1765 = vtanh.f32 %v251_v11  ;;  %v304_v11 = vld [vmem:[#allocation2 + $0xc0] sm:$0xff] }
  0xed   :  { %1767 = vtanh.f32 %v158_v12 }
  0xee   :  { %1769 = vtanh.f32 %v253_v13  ;;  %v162_v14 = vpop.f32.mrb[2].mxu0  ;;  %v257_v15 = vpop.f32.mrb[2].mxu1  ;;  %v306_v13 = vld [vmem:[#allocation2 + $0xd0] sm:$0xff] }
  0xef   :  { %1771 = vtanh.f32 %v162_v14  ;;  %v164_v16 = vpop.f32.mrb[3].mxu0  ;;  %v259_v17 = vpop.f32.mrb[3].mxu1  ;;  %v305_v14 = vld [vmem:[#allocation2 + $0xc8] sm:$0xff] }
  0xf0   :  { %1773 = vtanh.f32 %v257_v15 }
  0xf1   :  { %1775 = vtanh.f32 %v164_v16  ;;  %v307_v16 = vld [vmem:[#allocation2 + $0xd8] sm:$0xff] }
  0xf2   :  { %1777 = vtanh.f32 %v259_v17  ;;  %v168_v18 = vpop.f32.mrb[4].mxu0  ;;  %v263_v19 = vpop.f32.mrb[4].mxu1 }
  0xf3   :  { %1779 = vtanh.f32 %v168_v18  ;;  %v170_v20 = vpop.f32.mrb[5].mxu0  ;;  %v265_v21 = vpop.f32.mrb[5].mxu1 }
  0xf4   :  { %1781 = vtanh.f32 %v263_v19 }
  0xf5   :  { %v1764_v22 = vpop.eup %1763  ;;  %1783 = vtanh.f32 %v170_v20 }
  0xf6   :  { %v1766_v23 = vpop.eup %1765  ;;  %1785 = vtanh.f32 %v265_v21  ;;  %v174_v24 = vpop.f32.mrb[6].mxu0 }
  0xf7   :  { %v269_v25 = vpop.f32.mrb[6].mxu1  ;;  %v1768_v26 = vpop.eup %1767  ;;  %1787 = vtanh.f32 %v174_v24 }
  0xf8   :  { %v176_v27 = vpop.f32.mrb[7].mxu0  ;;  %v271_v28 = vpop.f32.mrb[7].mxu1  ;;  %1789 = vtanh.f32 %v269_v25  ;;  %v310_v25 = vld [vmem:[#allocation2 + $0xf0] sm:$0xff] }
  0xf9   :  { %v1770_v29 = vpop.eup %1769  ;;  %1791 = vtanh.f32 %v176_v27 }
  0xfa   :  { %v1772_v30 = vpop.eup %1771  ;;  %1793 = vtanh.f32 %v271_v28  ;;  %v180_v32 = vpop.f32.mrb[8].mxu0  ;;  %v311_v28 = vld [vmem:[#allocation2 + $0xf8] sm:$0xff] }
  0xfb   :  { %v1774_v31 = vpop.eup %1773  ;;  %v275_v33 = vpop.f32.mrb[8].mxu1  ;;  %v1679_v34 = vpack.c.bf16 %v1772_v30, %v1764_v22 }
  0xfc   :  { %v1776_v35 = vpop.eup %1775  ;;  %v182_v36 = vpop.f32.mrb[9].mxu0  ;;  %v1687_v38 = vpack.c.bf16 %v1774_v31, %v1766_v23  ;;  %v308_v23 = vld [vmem:[#allocation2 + $0xe0] sm:$0xff] }
  0xfd   :  { %v277_v37 = vpop.f32.mrb[9].mxu1  ;;  %v1778_v39 = vpop.eup %1777  ;;  %v1677_v40 = vpack.c.bf16 %v1776_v35, %v1768_v26  ;;  %1795 = vtanh.f32 %v182_v36  ;;  %v309_v26 = vld [vmem:[#allocation2 + $0xe8] sm:$0xff]  ;;  %v312_v35 = vld [vmem:[#allocation2 + $0x100] sm:$0xff] }
  0xfe   :  { %v1780_v41 = vpop.eup %1779  ;;  %v1685_v42 = vpack.c.bf16 %v1778_v39, %v1770_v29  ;;  %1797 = vtanh.f32 %v277_v37  ;;  %v314_v37 = vld [vmem:[#allocation2 + $0x110] sm:$0xff] }
  0xff   :  { %v1782_v43 = vpop.eup %1781  ;;  %1678 = vmatprep.subr.bf16.mxu0 %v1677_v40  ;;  %1799 = vtanh.f32 %v180_v32  ;;  %v315_v40 = vld [vmem:[#allocation2 + $0x118] sm:$0xff] }
 0x100   :  { %v1784_v44 = vpop.eup %1783  ;;  %1686 = vmatprep.subr.bf16.mxu1 %v1685_v42  ;;  %1680 = vmatpush1.bf16.msra.mxu0 %v1679_v34  ;;  %1801 = vtanh.f32 %v275_v33 }
 0x101   :  { %v1786_v45 = vpop.eup %1785  ;;  %1688 = vmatpush1.bf16.msra.mxu1 %v1687_v38  ;;  %v313_v38 = vld [vmem:[#allocation2 + $0x108] sm:$0xff] }
 0x102   :  { %v1788_v46 = vpop.eup %1787 }
 0x103   :  { %v1790_v47 = vpop.eup %1789  ;;  %v1683_v48 = vpack.c.bf16 %v1788_v46, %v1780_v41 }
 0x104   :  { %v1792_v49 = vpop.eup %1791  ;;  %v1691_v50 = vpack.c.bf16 %v1790_v47, %v1782_v43 }
 0x105   :  { %v1794_v51 = vpop.eup %1793  ;;  %v1681_v52 = vpack.c.bf16 %v1792_v49, %v1784_v44 }
 0x106   :  { %v1689_v53 = vpack.c.bf16 %v1794_v51, %v1786_v45  ;;  %v317_v51 = vld [vmem:[#allocation2 + $0x128] sm:$0xff] }
 0x107   :  { %1682 = vmatprep.subr.bf16.mxu0 %v1681_v52  ;;  %v1796_v54 = vpop.eup %1795 }
 0x108   :  { %1690 = vmatprep.subr.bf16.mxu1 %v1689_v53  ;;  %1684 = vmatpush1.bf16.msra.mxu0 %v1683_v48  ;;  %v1798_v55 = vpop.eup %1797 }
 0x109   :  { %1692 = vmatpush1.bf16.msra.mxu1 %v1691_v50  ;;  %344 = vmatprep.subr.mxu0 %v1796_v54  ;;  %v1800_v57 = vpop.eup %1799  ;;  %v319_v54 = vld [vmem:[#allocation2 + $0x138] sm:$0xff] }
 0x10a   :  { %439 = vmatprep.subr.mxu1 %v1798_v55  ;;  %v1802_v58 = vpop.eup %1801 }
 0x10c   :  { %345 = vmatpush1.msra.mxu0 %v1800_v57 }
 0x10d   :  { %440 = vmatpush1.msra.mxu1 %v1802_v58  ;;  %1631 = vmatmul.mubr.msk.f32.vlgmr.msra.gmra.mrb[10].mxu0 %vm320_vm2, %v34_v56 }
 0x10e   :  { %1636 = vmatmul.mubr.msk.f32.vlgmr.msra.gmra.mrb[10].mxu1 %vm320_vm2, %v34_v56  ;;  %406 = vmatprep.mubr.f32.mxu0 %v2038_v0  ;;  %v316_v56 = vld [vmem:[#allocation2 + $0x120] sm:$0xff] }
 0x10f   :  { %501 = vmatprep.mubr.f32.mxu1 %v2038_v0 }
 0x111   :  { %1632 = vmatmul.mubr.msk.f32.gmra.mrb[12].mxu0 %vm320_vm2, %v35_v59 }
 0x112   :  { %1637 = vmatmul.mubr.msk.f32.gmra.mrb[12].mxu1 %vm320_vm2, %v35_v59  ;;  %412 = vmatprep.mubr.f32.mxu0 %v2038_v0 }
 0x113   :  { %507 = vmatprep.mubr.f32.mxu1 %v2038_v0 }
 0x115   :  { %1633 = vmatmul.mubr.msk.f32.gmra.mrb[14].mxu0 %vm320_vm2, %v36_v60 }
 0x116   :  { %1638 = vmatmul.mubr.msk.f32.gmra.mrb[14].mxu1 %vm320_vm2, %v36_v60  ;;  %418 = vmatprep.mubr.f32.mxu0 %v2038_v0  ;;  %v318_v60 = vld [vmem:[#allocation2 + $0x130] sm:$0xff] }
 0x117   :  { %513 = vmatprep.mubr.f32.mxu1 %v2038_v0 }
 0x119   :  { %1634 = vmatmul.mubr.msk.f32.gmra.mrb[16].mxu0 %vm320_vm2, %v37_v61 }
 0x11a   :  { %1639 = vmatmul.mubr.msk.f32.gmra.mrb[16].mxu1 %vm320_vm2, %v37_v61  ;;  %424 = vmatprep.mubr.f32.mxu0 %v2038_v0 }
 0x11b   :  { %519 = vmatprep.mubr.f32.mxu1 %v2038_v0 }
 0x11d   :  { %1635 = vmatmul.mubr.msk.f32.gmra.mrb[18].mxu0 %vm320_vm2, %v38_v62 }
 0x11e   :  { %1640 = vmatmul.mubr.msk.f32.gmra.mrb[18].mxu1 %vm320_vm2, %v38_v62  ;;  %645 = vmatprep.mubr.f32.mxu0 %v2038_v0 }
 0x11f   :  { %740 = vmatprep.mubr.f32.mxu1 %v2038_v0 }
 0x1e0   :  { %v402_v3 = vpop.f32.mrb[10].mxu0 }
 0x1e1   :  { %v403_v5 = vadd.f32 %v402_v3, %v300_v63  ;;  %v497_v6 = vpop.f32.mrb[10].mxu1  ;;  %v404_v7 = vpop.f32.mrb[11].mxu0 }
 0x1e2   :  { %v498_v8 = vadd.f32 %v497_v6, %v302_v1  ;;  %v405_v9 = vadd.f32 %v404_v7, %v301_v2  ;;  %v499_v10 = vpop.f32.mrb[11].mxu1 }
 0x1e3   :  { %1803 = vtanh.f32 %v403_v5  ;;  %v500_v12 = vadd.f32 %v499_v10, %v303_v4 }
 0x1e4   :  { %1805 = vtanh.f32 %v498_v8  ;;  %v408_v15 = vpop.f32.mrb[12].mxu0 }
 0x1e5   :  { %1807 = vtanh.f32 %v405_v9  ;;  %v409_v17 = vadd.f32 %v408_v15, %v304_v11  ;;  %v503_v18 = vpop.f32.mrb[12].mxu1  ;;  %v410_v19 = vpop.f32.mrb[13].mxu0 }
 0x1e6   :  { %1809 = vtanh.f32 %v500_v12  ;;  %v504_v20 = vadd.f32 %v503_v18, %v306_v13  ;;  %v411_v21 = vadd.f32 %v410_v19, %v305_v14  ;;  %v505_v22 = vpop.f32.mrb[13].mxu1 }
 0x1e7   :  { %1811 = vtanh.f32 %v409_v17  ;;  %v506_v24 = vadd.f32 %v505_v22, %v307_v16 }
 0x1e8   :  { %1813 = vtanh.f32 %v504_v20  ;;  %v414_v27 = vpop.f32.mrb[14].mxu0 }
 0x1e9   :  { %1815 = vtanh.f32 %v411_v21  ;;  %v415_v29 = vadd.f32 %v414_v27, %v308_v23  ;;  %v509_v30 = vpop.f32.mrb[14].mxu1  ;;  %v416_v31 = vpop.f32.mrb[15].mxu0  ;;  %v39_v23 = vld [vmem:[%s2297_s0 + $0x50] sm:$0xff]  ;;  %v41_v27 = vld [vmem:[%s2297_s0 + $0x60] sm:$0xff] }
 0x1ea   :  { %1817 = vtanh.f32 %v506_v24  ;;  %v510_v32 = vadd.f32 %v509_v30, %v310_v25  ;;  %v417_v33 = vadd.f32 %v416_v31, %v309_v26  ;;  %v511_v34 = vpop.f32.mrb[15].mxu1  ;;  %v40_v26 = vld [vmem:[%s2297_s0 + $0x58] sm:$0xff]  ;;  %v546_v30 = vld [vmem:[#allocation2 + $0x140] sm:$0xff]  ;;  %v548_v31 = vld [vmem:[#allocation2 + $0x150] sm:$0xff] }
 0x1eb   :  { %1819 = vtanh.f32 %v415_v29  ;;  %v512_v36 = vadd.f32 %v511_v34, %v311_v28  ;;  %v42_v28 = vld [vmem:[%s2297_s0 + $0x68] sm:$0xff]  ;;  %v43_v29 = vld [vmem:[%s2297_s0 + $0x70] sm:$0xff] }
 0x1ec   :  { %1821 = vtanh.f32 %v510_v32  ;;  %v420_v39 = vpop.f32.mrb[16].mxu0  ;;  %v547_v32 = vld [vmem:[#allocation2 + $0x148] sm:$0xff]  ;;  %v549_v34 = vld [vmem:[#allocation2 + $0x158] sm:$0xff] }
 0x1ed   :  { %v1804_v41 = vpop.eup %1803  ;;  %1823 = vtanh.f32 %v417_v33  ;;  %v421_v42 = vadd.f32 %v420_v39, %v312_v35  ;;  %v515_v43 = vpop.f32.mrb[16].mxu1 }
 0x1ee   :  { %v422_v44 = vpop.f32.mrb[17].mxu0  ;;  %v1806_v45 = vpop.eup %1805  ;;  %1825 = vtanh.f32 %v512_v36  ;;  %v516_v46 = vadd.f32 %v515_v43, %v314_v37  ;;  %v552_v43 = vld [vmem:[#allocation2 + $0x170] sm:$0xff] }
 0x1ef   :  { %v423_v47 = vadd.f32 %v422_v44, %v313_v38  ;;  %v517_v48 = vpop.f32.mrb[17].mxu1  ;;  %v1808_v49 = vpop.eup %1807  ;;  %1827 = vtanh.f32 %v421_v42  ;;  %v551_v44 = vld [vmem:[#allocation2 + $0x168] sm:$0xff] }
 0x1f0   :  { %v518_v50 = vadd.f32 %v517_v48, %v315_v40  ;;  %v1810_v52 = vpop.eup %1809  ;;  %1829 = vtanh.f32 %v516_v46  ;;  %v426_v53 = vpop.f32.mrb[18].mxu0  ;;  %v553_v46 = vld [vmem:[#allocation2 + $0x178] sm:$0xff] }
 0x1f1   :  { %v1812_v55 = vpop.eup %1811  ;;  %1831 = vtanh.f32 %v423_v47  ;;  %v521_v57 = vpop.f32.mrb[18].mxu1  ;;  %v427_v5 = vadd.f32 %v426_v53, %v316_v56  ;;  %v554_v53 = vld [vmem:[#allocation2 + $0x180] sm:$0xff]  ;;  %v555_v56 = vld [vmem:[#allocation2 + $0x188] sm:$0xff] }
 0x1f2   :  { %v428_v58 = vpop.f32.mrb[19].mxu0  ;;  %v1814_v59 = vpop.eup %1813  ;;  %1833 = vtanh.f32 %v518_v50  ;;  %v1695_v63 = vpack.c.bf16 %v1812_v55, %v1804_v41  ;;  %v522_v8 = vadd.f32 %v521_v57, %v318_v60  ;;  %v550_v41 = vld [vmem:[#allocation2 + $0x160] sm:$0xff]  ;;  %v556_v55 = vld [vmem:[#allocation2 + $0x190] sm:$0xff] }
 0x1f3   :  { %v429_v61 = vadd.f32 %v428_v58, %v317_v51  ;;  %v523_v62 = vpop.f32.mrb[19].mxu1  ;;  %v1816_v1 = vpop.eup %1815  ;;  %v1703_v3 = vpack.c.bf16 %v1814_v59, %v1806_v45  ;;  %v557_v58 = vld [vmem:[#allocation2 + $0x198] sm:$0xff] }
 0x1f4   :  { %v524_v2 = vadd.f32 %v523_v62, %v319_v54  ;;  %v1818_v4 = vpop.eup %1817  ;;  %v1693_v6 = vpack.c.bf16 %v1816_v1, %v1808_v49 }
 0x1f5   :  { %v1820_v7 = vpop.eup %1819  ;;  %1835 = vtanh.f32 %v429_v61  ;;  %v1701_v9 = vpack.c.bf16 %v1818_v4, %v1810_v52  ;;  %v560_v4 = vld [vmem:[#allocation2 + $0x1b0] sm:$0xff] }
 0x1f6   :  { %v1822_v10 = vpop.eup %1821  ;;  %1837 = vtanh.f32 %v524_v2  ;;  %1694 = vmatprep.subr.bf16.mxu0 %v1693_v6  ;;  %v558_v2 = vld [vmem:[#allocation2 + $0x1a0] sm:$0xff] }
 0x1f7   :  { %v1824_v11 = vpop.eup %1823  ;;  %1702 = vmatprep.subr.bf16.mxu1 %v1701_v9  ;;  %1696 = vmatpush1.bf16.msra.mxu0 %v1695_v63  ;;  %1839 = vtanh.f32 %v427_v5  ;;  %v559_v5 = vld [vmem:[#allocation2 + $0x1a8] sm:$0xff] }
 0x1f8   :  { %v1826_v12 = vpop.eup %1825  ;;  %1704 = vmatpush1.bf16.msra.mxu1 %v1703_v3  ;;  %1841 = vtanh.f32 %v522_v8 }
 0x1f9   :  { %v1828_v13 = vpop.eup %1827 }
 0x1fa   :  { %v1830_v14 = vpop.eup %1829  ;;  %v1699_v15 = vpack.c.bf16 %v1828_v13, %v1820_v7  ;;  %v561_v7 = vld [vmem:[#allocation2 + $0x1b8] sm:$0xff] }
 0x1fb   :  { %v1832_v16 = vpop.eup %1831  ;;  %v1707_v17 = vpack.c.bf16 %v1830_v14, %v1822_v10 }
 0x1fc   :  { %v1834_v18 = vpop.eup %1833  ;;  %v1697_v19 = vpack.c.bf16 %v1832_v16, %v1824_v11 }
 0x1fd   :  { %v1705_v20 = vpack.c.bf16 %v1834_v18, %v1826_v12  ;;  %v563_v18 = vld [vmem:[#allocation2 + $0x1c8] sm:$0xff] }
 0x1fe   :  { %1698 = vmatprep.subr.bf16.mxu0 %v1697_v19 }
 0x1ff   :  { %v1836_v21 = vpop.eup %1835  ;;  %1706 = vmatprep.subr.bf16.mxu1 %v1705_v20  ;;  %1700 = vmatpush1.bf16.msra.mxu0 %v1699_v15 }
 0x200   :  { %v1838_v22 = vpop.eup %1837  ;;  %1708 = vmatpush1.bf16.msra.mxu1 %v1707_v17  ;;  %589 = vmatprep.subr.mxu0 %v1836_v21  ;;  %v565_v21 = vld [vmem:[#allocation2 + $0x1d8] sm:$0xff] }
 0x201   :  { %684 = vmatprep.subr.mxu1 %v1838_v22  ;;  %v1840_v24 = vpop.eup %1839 }
 0x202   :  { %v1842_v25 = vpop.eup %1841 }
 0x203   :  { %590 = vmatpush1.msra.mxu0 %v1840_v24 }
 0x204   :  { %685 = vmatpush1.msra.mxu1 %v1842_v25  ;;  %1641 = vmatmul.mubr.msk.f32.vlgmr.msra.gmra.mrb[20].mxu0 %vm320_vm2, %v39_v23 }
 0x205   :  { %1646 = vmatmul.mubr.msk.f32.vlgmr.msra.gmra.mrb[20].mxu1 %vm320_vm2, %v39_v23  ;;  %651 = vmatprep.mubr.f32.mxu0 %v2038_v0  ;;  %v562_v23 = vld [vmem:[#allocation2 + $0x1c0] sm:$0xff] }
 0x206   :  { %746 = vmatprep.mubr.f32.mxu1 %v2038_v0 }
 0x208   :  { %1642 = vmatmul.mubr.msk.f32.gmra.mrb[22].mxu0 %vm320_vm2, %v40_v26 }
 0x209   :  { %1647 = vmatmul.mubr.msk.f32.gmra.mrb[22].mxu1 %vm320_vm2, %v40_v26  ;;  %657 = vmatprep.mubr.f32.mxu0 %v2038_v0 }
 0x20a   :  { %752 = vmatprep.mubr.f32.mxu1 %v2038_v0 }
 0x20c   :  { %1643 = vmatmul.mubr.msk.f32.gmra.mrb[24].mxu0 %vm320_vm2, %v41_v27 }
 0x20d   :  { %1648 = vmatmul.mubr.msk.f32.gmra.mrb[24].mxu1 %vm320_vm2, %v41_v27  ;;  %663 = vmatprep.mubr.f32.mxu0 %v2038_v0  ;;  %v564_v27 = vld [vmem:[#allocation2 + $0x1d0] sm:$0xff] }
 0x20e   :  { %758 = vmatprep.mubr.f32.mxu1 %v2038_v0 }
 0x210   :  { %1644 = vmatmul.mubr.msk.f32.gmra.mrb[26].mxu0 %vm320_vm2, %v42_v28 }
 0x211   :  { %1649 = vmatmul.mubr.msk.f32.gmra.mrb[26].mxu1 %vm320_vm2, %v42_v28  ;;  %669 = vmatprep.mubr.f32.mxu0 %v2038_v0 }
 0x212   :  { %764 = vmatprep.mubr.f32.mxu1 %v2038_v0 }
 0x214   :  { %1645 = vmatmul.mubr.msk.f32.gmra.mrb[28].mxu0 %vm320_vm2, %v43_v29 }
 0x215   :  { %1650 = vmatmul.mubr.msk.f32.gmra.mrb[28].mxu1 %vm320_vm2, %v43_v29  ;;  %890 = vmatprep.mubr.f32.mxu0 %v2038_v0 }
 0x216   :  { %985 = vmatprep.mubr.f32.mxu1 %v2038_v0 }
 0x2d7   :  { %v647_v33 = vpop.f32.mrb[20].mxu0 }
 0x2d8   :  { %v648_v35 = vadd.f32 %v647_v33, %v546_v30  ;;  %v742_v36 = vpop.f32.mrb[20].mxu1  ;;  %v649_v37 = vpop.f32.mrb[21].mxu0 }
 0x2d9   :  { %v743_v38 = vadd.f32 %v742_v36, %v548_v31  ;;  %v650_v39 = vadd.f32 %v649_v37, %v547_v32  ;;  %v744_v40 = vpop.f32.mrb[21].mxu1 }
 0x2da   :  { %1843 = vtanh.f32 %v648_v35  ;;  %v745_v42 = vadd.f32 %v744_v40, %v549_v34 }
 0x2db   :  { %1845 = vtanh.f32 %v743_v38  ;;  %v653_v45 = vpop.f32.mrb[22].mxu0 }
 0x2dc   :  { %1847 = vtanh.f32 %v650_v39  ;;  %v654_v47 = vadd.f32 %v653_v45, %v550_v41  ;;  %v748_v48 = vpop.f32.mrb[22].mxu1  ;;  %v655_v49 = vpop.f32.mrb[23].mxu0 }
 0x2dd   :  { %1849 = vtanh.f32 %v745_v42  ;;  %v749_v50 = vadd.f32 %v748_v48, %v552_v43  ;;  %v656_v51 = vadd.f32 %v655_v49, %v551_v44  ;;  %v750_v52 = vpop.f32.mrb[23].mxu1 }
 0x2de   :  { %1851 = vtanh.f32 %v654_v47  ;;  %v751_v54 = vadd.f32 %v750_v52, %v553_v46 }
 0x2df   :  { %1853 = vtanh.f32 %v749_v50  ;;  %v659_v57 = vpop.f32.mrb[24].mxu0 }
 0x2e0   :  { %1855 = vtanh.f32 %v656_v51  ;;  %v660_v59 = vadd.f32 %v659_v57, %v554_v53  ;;  %v754_v60 = vpop.f32.mrb[24].mxu1  ;;  %v661_v61 = vpop.f32.mrb[25].mxu0  ;;  %v44_v53 = vld [vmem:[%s2297_s0 + $0x78] sm:$0xff]  ;;  %v46_v57 = vld [vmem:[%s2297_s0 + $0x88] sm:$0xff] }
 0x2e1   :  { %1857 = vtanh.f32 %v751_v54  ;;  %v755_v62 = vadd.f32 %v754_v60, %v556_v55  ;;  %v662_v63 = vadd.f32 %v661_v61, %v555_v56  ;;  %v756_v1 = vpop.f32.mrb[25].mxu1  ;;  %v45_v56 = vld [vmem:[%s2297_s0 + $0x80] sm:$0xff]  ;;  %v791_v60 = vld [vmem:[#allocation2 + $0x1e0] sm:$0xff] }
 0x2e2   :  { %1859 = vtanh.f32 %v660_v59  ;;  %v757_v3 = vadd.f32 %v756_v1, %v557_v58  ;;  %v47_v58 = vld [vmem:[%s2297_s0 + $0x90] sm:$0xff]  ;;  %v48_v59 = vld [vmem:[%s2297_s0 + $0x98] sm:$0xff]  ;;  %v793_v61 = vld [vmem:[#allocation2 + $0x1f0] sm:$0xff] }
 0x2e3   :  { %1861 = vtanh.f32 %v755_v62  ;;  %v665_v6 = vpop.f32.mrb[26].mxu0  ;;  %v792_v62 = vld [vmem:[#allocation2 + $0x1e8] sm:$0xff]  ;;  %v794_v1 = vld [vmem:[#allocation2 + $0x1f8] sm:$0xff] }
 0x2e4   :  { %v1844_v8 = vpop.eup %1843  ;;  %1863 = vtanh.f32 %v662_v63  ;;  %v666_v9 = vadd.f32 %v665_v6, %v558_v2  ;;  %v760_v10 = vpop.f32.mrb[26].mxu1 }
 0x2e5   :  { %v667_v11 = vpop.f32.mrb[27].mxu0  ;;  %v1846_v12 = vpop.eup %1845  ;;  %1865 = vtanh.f32 %v757_v3  ;;  %v761_v13 = vadd.f32 %v760_v10, %v560_v4  ;;  %v797_v10 = vld [vmem:[#allocation2 + $0x210] sm:$0xff] }
 0x2e6   :  { %v668_v14 = vadd.f32 %v667_v11, %v559_v5  ;;  %v762_v15 = vpop.f32.mrb[27].mxu1  ;;  %v1848_v16 = vpop.eup %1847  ;;  %1867 = vtanh.f32 %v666_v9  ;;  %v796_v11 = vld [vmem:[#allocation2 + $0x208] sm:$0xff] }
 0x2e7   :  { %v763_v17 = vadd.f32 %v762_v15, %v561_v7  ;;  %v1850_v19 = vpop.eup %1849  ;;  %1869 = vtanh.f32 %v761_v13  ;;  %v671_v20 = vpop.f32.mrb[28].mxu0  ;;  %v798_v13 = vld [vmem:[#allocation2 + $0x218] sm:$0xff] }
 0x2e8   :  { %v1852_v22 = vpop.eup %1851  ;;  %1871 = vtanh.f32 %v668_v14  ;;  %v766_v24 = vpop.f32.mrb[28].mxu1  ;;  %v672_v35 = vadd.f32 %v671_v20, %v562_v23  ;;  %v799_v20 = vld [vmem:[#allocation2 + $0x220] sm:$0xff]  ;;  %v800_v23 = vld [vmem:[#allocation2 + $0x228] sm:$0xff] }
 0x2e9   :  { %v673_v25 = vpop.f32.mrb[29].mxu0  ;;  %v1854_v26 = vpop.eup %1853  ;;  %1873 = vtanh.f32 %v763_v17  ;;  %v1711_v30 = vpack.c.bf16 %v1852_v22, %v1844_v8  ;;  %v767_v38 = vadd.f32 %v766_v24, %v564_v27  ;;  %v795_v8 = vld [vmem:[#allocation2 + $0x200] sm:$0xff]  ;;  %v801_v22 = vld [vmem:[#allocation2 + $0x230] sm:$0xff] }
 0x2ea   :  { %v674_v28 = vadd.f32 %v673_v25, %v563_v18  ;;  %v768_v29 = vpop.f32.mrb[29].mxu1  ;;  %v1856_v31 = vpop.eup %1855  ;;  %v1719_v33 = vpack.c.bf16 %v1854_v26, %v1846_v12  ;;  %v802_v25 = vld [vmem:[#allocation2 + $0x238] sm:$0xff] }
 0x2eb   :  { %v769_v32 = vadd.f32 %v768_v29, %v565_v21  ;;  %v1858_v34 = vpop.eup %1857  ;;  %v1709_v36 = vpack.c.bf16 %v1856_v31, %v1848_v16 }
 0x2ec   :  { %v1860_v37 = vpop.eup %1859  ;;  %1875 = vtanh.f32 %v674_v28  ;;  %v1717_v39 = vpack.c.bf16 %v1858_v34, %v1850_v19  ;;  %v805_v34 = vld [vmem:[#allocation2 + $0x250] sm:$0xff] }
 0x2ed   :  { %v1862_v40 = vpop.eup %1861  ;;  %1877 = vtanh.f32 %v769_v32  ;;  %1710 = vmatprep.subr.bf16.mxu0 %v1709_v36  ;;  %v803_v32 = vld [vmem:[#allocation2 + $0x240] sm:$0xff] }
 0x2ee   :  { %v1864_v41 = vpop.eup %1863  ;;  %1718 = vmatprep.subr.bf16.mxu1 %v1717_v39  ;;  %1712 = vmatpush1.bf16.msra.mxu0 %v1711_v30  ;;  %1879 = vtanh.f32 %v672_v35  ;;  %v804_v35 = vld [vmem:[#allocation2 + $0x248] sm:$0xff] }
 0x2ef   :  { %v1866_v42 = vpop.eup %1865  ;;  %1720 = vmatpush1.bf16.msra.mxu1 %v1719_v33  ;;  %1881 = vtanh.f32 %v767_v38 }
 0x2f0   :  { %v1868_v43 = vpop.eup %1867 }
 0x2f1   :  { %v1870_v44 = vpop.eup %1869  ;;  %v1715_v45 = vpack.c.bf16 %v1868_v43, %v1860_v37  ;;  %v806_v37 = vld [vmem:[#allocation2 + $0x258] sm:$0xff] }
 0x2f2   :  { %v1872_v46 = vpop.eup %1871  ;;  %v1723_v47 = vpack.c.bf16 %v1870_v44, %v1862_v40 }
 0x2f3   :  { %v1874_v48 = vpop.eup %1873  ;;  %v1713_v49 = vpack.c.bf16 %v1872_v46, %v1864_v41 }
 0x2f4   :  { %v1721_v50 = vpack.c.bf16 %v1874_v48, %v1866_v42  ;;  %v808_v48 = vld [vmem:[#allocation2 + $0x268] sm:$0xff] }
 0x2f5   :  { %1714 = vmatprep.subr.bf16.mxu0 %v1713_v49 }
 0x2f6   :  { %v1876_v51 = vpop.eup %1875  ;;  %1722 = vmatprep.subr.bf16.mxu1 %v1721_v50  ;;  %1716 = vmatpush1.bf16.msra.mxu0 %v1715_v45 }
 0x2f7   :  { %v1878_v52 = vpop.eup %1877  ;;  %1724 = vmatpush1.bf16.msra.mxu1 %v1723_v47  ;;  %834 = vmatprep.subr.mxu0 %v1876_v51  ;;  %v810_v51 = vld [vmem:[#allocation2 + $0x278] sm:$0xff] }
 0x2f8   :  { %929 = vmatprep.subr.mxu1 %v1878_v52  ;;  %v1880_v54 = vpop.eup %1879 }
 0x2f9   :  { %v1882_v55 = vpop.eup %1881 }
 0x2fa   :  { %835 = vmatpush1.msra.mxu0 %v1880_v54 }
 0x2fb   :  { %930 = vmatpush1.msra.mxu1 %v1882_v55  ;;  %1651 = vmatmul.mubr.msk.f32.vlgmr.msra.gmra.mrb[30].mxu0 %vm320_vm2, %v44_v53 }
 0x2fc   :  { %1656 = vmatmul.mubr.msk.f32.vlgmr.msra.gmra.mrb[30].mxu1 %vm320_vm2, %v44_v53  ;;  %896 = vmatprep.mubr.f32.mxu0 %v2038_v0  ;;  %v807_v53 = vld [vmem:[#allocation2 + $0x260] sm:$0xff] }
 0x2fd   :  { %991 = vmatprep.mubr.f32.mxu1 %v2038_v0 }
 0x2ff   :  { %1652 = vmatmul.mubr.msk.f32.gmra.mrb[32].mxu0 %vm320_vm2, %v45_v56 }
 0x300   :  { %1657 = vmatmul.mubr.msk.f32.gmra.mrb[32].mxu1 %vm320_vm2, %v45_v56  ;;  %902 = vmatprep.mubr.f32.mxu0 %v2038_v0 }
 0x301   :  { %997 = vmatprep.mubr.f32.mxu1 %v2038_v0 }
 0x303   :  { %1653 = vmatmul.mubr.msk.f32.gmra.mrb[34].mxu0 %vm320_vm2, %v46_v57 }
 0x304   :  { %1658 = vmatmul.mubr.msk.f32.gmra.mrb[34].mxu1 %vm320_vm2, %v46_v57  ;;  %908 = vmatprep.mubr.f32.mxu0 %v2038_v0  ;;  %v809_v57 = vld [vmem:[#allocation2 + $0x270] sm:$0xff] }
 0x305   :  { %1003 = vmatprep.mubr.f32.mxu1 %v2038_v0 }
 0x307   :  { %1654 = vmatmul.mubr.msk.f32.gmra.mrb[36].mxu0 %vm320_vm2, %v47_v58 }
 0x308   :  { %1659 = vmatmul.mubr.msk.f32.gmra.mrb[36].mxu1 %vm320_vm2, %v47_v58  ;;  %914 = vmatprep.mubr.f32.mxu0 %v2038_v0 }
 0x309   :  { %1009 = vmatprep.mubr.f32.mxu1 %v2038_v0 }
 0x30b   :  { %1655 = vmatmul.mubr.msk.f32.gmra.mrb[38].mxu0 %vm320_vm2, %v48_v59 }
 0x30c   :  { %1660 = vmatmul.mubr.msk.f32.gmra.mrb[38].mxu1 %vm320_vm2, %v48_v59  ;;  %1135 = vmatprep.mubr.f32.mxu0 %v2038_v0 }
 0x30d   :  { %1230 = vmatprep.mubr.f32.mxu1 %v2038_v0 }
 0x3ce   :  { %v892_v63 = vpop.f32.mrb[30].mxu0 }
 0x3cf   :  { %v893_v2 = vadd.f32 %v892_v63, %v791_v60  ;;  %v987_v3 = vpop.f32.mrb[30].mxu1  ;;  %v894_v4 = vpop.f32.mrb[31].mxu0 }
 0x3d0   :  { %v988_v5 = vadd.f32 %v987_v3, %v793_v61  ;;  %v895_v6 = vadd.f32 %v894_v4, %v792_v62  ;;  %v989_v7 = vpop.f32.mrb[31].mxu1 }
 0x3d1   :  { %1883 = vtanh.f32 %v893_v2  ;;  %v990_v9 = vadd.f32 %v989_v7, %v794_v1 }
 0x3d2   :  { %1885 = vtanh.f32 %v988_v5  ;;  %v898_v12 = vpop.f32.mrb[32].mxu0 }
 0x3d3   :  { %1887 = vtanh.f32 %v895_v6  ;;  %v899_v14 = vadd.f32 %v898_v12, %v795_v8  ;;  %v993_v15 = vpop.f32.mrb[32].mxu1  ;;  %v900_v16 = vpop.f32.mrb[33].mxu0 }
 0x3d4   :  { %1889 = vtanh.f32 %v990_v9  ;;  %v994_v17 = vadd.f32 %v993_v15, %v797_v10  ;;  %v901_v18 = vadd.f32 %v900_v16, %v796_v11  ;;  %v995_v19 = vpop.f32.mrb[33].mxu1 }
 0x3d5   :  { %1891 = vtanh.f32 %v899_v14  ;;  %v996_v21 = vadd.f32 %v995_v19, %v798_v13 }
 0x3d6   :  { %1893 = vtanh.f32 %v994_v17  ;;  %v904_v24 = vpop.f32.mrb[34].mxu0 }
 0x3d7   :  { %1895 = vtanh.f32 %v901_v18  ;;  %v905_v26 = vadd.f32 %v904_v24, %v799_v20  ;;  %v999_v27 = vpop.f32.mrb[34].mxu1  ;;  %v906_v28 = vpop.f32.mrb[35].mxu0  ;;  %v49_v20 = vld [vmem:[%s2297_s0 + $0xa0] sm:$0xff]  ;;  %v51_v24 = vld [vmem:[%s2297_s0 + $0xb0] sm:$0xff] }
 0x3d8   :  { %1897 = vtanh.f32 %v996_v21  ;;  %v1000_v29 = vadd.f32 %v999_v27, %v801_v22  ;;  %v907_v30 = vadd.f32 %v906_v28, %v800_v23  ;;  %v1001_v31 = vpop.f32.mrb[35].mxu1  ;;  %v50_v23 = vld [vmem:[%s2297_s0 + $0xa8] sm:$0xff]  ;;  %v1036_v27 = vld [vmem:[#allocation2 + $0x280] sm:$0xff]  ;;  %v1038_v28 = vld [vmem:[#allocation2 + $0x290] sm:$0xff] }
 0x3d9   :  { %1899 = vtanh.f32 %v905_v26  ;;  %v1002_v33 = vadd.f32 %v1001_v31, %v802_v25  ;;  %v52_v25 = vld [vmem:[%s2297_s0 + $0xb8] sm:$0xff]  ;;  %v53_v26 = vld [vmem:[%s2297_s0 + $0xc0] sm:$0xff]  ;;  %v1039_v31 = vld [vmem:[#allocation2 + $0x298] sm:$0xff] }
 0x3da   :  { %1901 = vtanh.f32 %v1000_v29  ;;  %v910_v36 = vpop.f32.mrb[36].mxu0  ;;  %v1037_v29 = vld [vmem:[#allocation2 + $0x288] sm:$0xff] }
 0x3db   :  { %v1884_v38 = vpop.eup %1883  ;;  %1903 = vtanh.f32 %v907_v30  ;;  %v911_v39 = vadd.f32 %v910_v36, %v803_v32  ;;  %v1005_v40 = vpop.f32.mrb[36].mxu1 }
 0x3dc   :  { %v912_v41 = vpop.f32.mrb[37].mxu0  ;;  %v1886_v42 = vpop.eup %1885  ;;  %1905 = vtanh.f32 %v1002_v33  ;;  %v1006_v43 = vadd.f32 %v1005_v40, %v805_v34  ;;  %v1042_v40 = vld [vmem:[#allocation2 + $0x2b0] sm:$0xff] }
 0x3dd   :  { %v913_v44 = vadd.f32 %v912_v41, %v804_v35  ;;  %v1007_v45 = vpop.f32.mrb[37].mxu1  ;;  %v1888_v46 = vpop.eup %1887  ;;  %1907 = vtanh.f32 %v911_v39  ;;  %v1041_v41 = vld [vmem:[#allocation2 + $0x2a8] sm:$0xff] }
 0x3de   :  { %v1008_v47 = vadd.f32 %v1007_v45, %v806_v37  ;;  %v1890_v49 = vpop.eup %1889  ;;  %1909 = vtanh.f32 %v1006_v43  ;;  %v916_v50 = vpop.f32.mrb[38].mxu0  ;;  %v1043_v43 = vld [vmem:[#allocation2 + $0x2b8] sm:$0xff] }
 0x3df   :  { %v1892_v52 = vpop.eup %1891  ;;  %1911 = vtanh.f32 %v913_v44  ;;  %v1011_v54 = vpop.f32.mrb[38].mxu1  ;;  %v917_v2 = vadd.f32 %v916_v50, %v807_v53  ;;  %v1044_v50 = vld [vmem:[#allocation2 + $0x2c0] sm:$0xff]  ;;  %v1045_v53 = vld [vmem:[#allocation2 + $0x2c8] sm:$0xff] }
 0x3e0   :  { %v918_v55 = vpop.f32.mrb[39].mxu0  ;;  %v1894_v56 = vpop.eup %1893  ;;  %1913 = vtanh.f32 %v1008_v47  ;;  %v1727_v60 = vpack.c.bf16 %v1892_v52, %v1884_v38  ;;  %v1012_v5 = vadd.f32 %v1011_v54, %v809_v57  ;;  %v1040_v38 = vld [vmem:[#allocation2 + $0x2a0] sm:$0xff]  ;;  %v1046_v52 = vld [vmem:[#allocation2 + $0x2d0] sm:$0xff] }
 0x3e1   :  { %v919_v58 = vadd.f32 %v918_v55, %v808_v48  ;;  %v1013_v59 = vpop.f32.mrb[39].mxu1  ;;  %v1896_v61 = vpop.eup %1895  ;;  %v1735_v63 = vpack.c.bf16 %v1894_v56, %v1886_v42  ;;  %v1047_v55 = vld [vmem:[#allocation2 + $0x2d8] sm:$0xff] }
 0x3e2   :  { %v1014_v62 = vadd.f32 %v1013_v59, %v810_v51  ;;  %v1898_v1 = vpop.eup %1897  ;;  %v1725_v3 = vpack.c.bf16 %v1896_v61, %v1888_v46 }
 0x3e3   :  { %v1900_v4 = vpop.eup %1899  ;;  %1915 = vtanh.f32 %v919_v58  ;;  %v1733_v6 = vpack.c.bf16 %v1898_v1, %v1890_v49  ;;  %v1050_v1 = vld [vmem:[#allocation2 + $0x2f0] sm:$0xff] }
 0x3e4   :  { %v1902_v7 = vpop.eup %1901  ;;  %1917 = vtanh.f32 %v1014_v62  ;;  %1726 = vmatprep.subr.bf16.mxu0 %v1725_v3  ;;  %v1048_v62 = vld [vmem:[#allocation2 + $0x2e0] sm:$0xff] }
 0x3e5   :  { %v1904_v8 = vpop.eup %1903  ;;  %1734 = vmatprep.subr.bf16.mxu1 %v1733_v6  ;;  %1728 = vmatpush1.bf16.msra.mxu0 %v1727_v60  ;;  %1919 = vtanh.f32 %v917_v2  ;;  %v1049_v2 = vld [vmem:[#allocation2 + $0x2e8] sm:$0xff] }
 0x3e6   :  { %v1906_v9 = vpop.eup %1905  ;;  %1736 = vmatpush1.bf16.msra.mxu1 %v1735_v63  ;;  %1921 = vtanh.f32 %v1012_v5 }
 0x3e7   :  { %v1908_v10 = vpop.eup %1907 }
 0x3e8   :  { %v1910_v11 = vpop.eup %1909  ;;  %v1731_v12 = vpack.c.bf16 %v1908_v10, %v1900_v4  ;;  %v1051_v4 = vld [vmem:[#allocation2 + $0x2f8] sm:$0xff] }
 0x3e9   :  { %v1912_v13 = vpop.eup %1911  ;;  %v1739_v14 = vpack.c.bf16 %v1910_v11, %v1902_v7 }
 0x3ea   :  { %v1914_v15 = vpop.eup %1913  ;;  %v1729_v16 = vpack.c.bf16 %v1912_v13, %v1904_v8 }
 0x3eb   :  { %v1737_v17 = vpack.c.bf16 %v1914_v15, %v1906_v9  ;;  %v1053_v15 = vld [vmem:[#allocation2 + $0x308] sm:$0xff] }
 0x3ec   :  { %1730 = vmatprep.subr.bf16.mxu0 %v1729_v16 }
 0x3ed   :  { %v1916_v18 = vpop.eup %1915  ;;  %1738 = vmatprep.subr.bf16.mxu1 %v1737_v17  ;;  %1732 = vmatpush1.bf16.msra.mxu0 %v1731_v12 }
 0x3ee   :  { %v1918_v19 = vpop.eup %1917  ;;  %1740 = vmatpush1.bf16.msra.mxu1 %v1739_v14  ;;  %1079 = vmatprep.subr.mxu0 %v1916_v18  ;;  %v1055_v18 = vld [vmem:[#allocation2 + $0x318] sm:$0xff] }
 0x3ef   :  { %1174 = vmatprep.subr.mxu1 %v1918_v19  ;;  %v1920_v21 = vpop.eup %1919 }
 0x3f0   :  { %v1922_v22 = vpop.eup %1921 }
 0x3f1   :  { %1080 = vmatpush1.msra.mxu0 %v1920_v21 }
 0x3f2   :  { %1175 = vmatpush1.msra.mxu1 %v1922_v22  ;;  %1661 = vmatmul.mubr.msk.f32.vlgmr.msra.gmra.mrb[40].mxu0 %vm320_vm2, %v49_v20 }
 0x3f3   :  { %1666 = vmatmul.mubr.msk.f32.vlgmr.msra.gmra.mrb[40].mxu1 %vm320_vm2, %v49_v20  ;;  %1141 = vmatprep.mubr.f32.mxu0 %v2038_v0  ;;  %v1052_v20 = vld [vmem:[#allocation2 + $0x300] sm:$0xff] }
 0x3f4   :  { %1236 = vmatprep.mubr.f32.mxu1 %v2038_v0 }
 0x3f6   :  { %1662 = vmatmul.mubr.msk.f32.gmra.mrb[42].mxu0 %vm320_vm2, %v50_v23 }
 0x3f7   :  { %1667 = vmatmul.mubr.msk.f32.gmra.mrb[42].mxu1 %vm320_vm2, %v50_v23  ;;  %1147 = vmatprep.mubr.f32.mxu0 %v2038_v0 }
 0x3f8   :  { %1242 = vmatprep.mubr.f32.mxu1 %v2038_v0 }
 0x3fa   :  { %1663 = vmatmul.mubr.msk.f32.gmra.mrb[44].mxu0 %vm320_vm2, %v51_v24 }
 0x3fb   :  { %1668 = vmatmul.mubr.msk.f32.gmra.mrb[44].mxu1 %vm320_vm2, %v51_v24  ;;  %1153 = vmatprep.mubr.f32.mxu0 %v2038_v0  ;;  %v1054_v24 = vld [vmem:[#allocation2 + $0x310] sm:$0xff] }
 0x3fc   :  { %1248 = vmatprep.mubr.f32.mxu1 %v2038_v0 }
 0x3fe   :  { %1664 = vmatmul.mubr.msk.f32.gmra.mrb[46].mxu0 %vm320_vm2, %v52_v25 }
 0x3ff   :  { %1669 = vmatmul.mubr.msk.f32.gmra.mrb[46].mxu1 %vm320_vm2, %v52_v25  ;;  %1159 = vmatprep.mubr.f32.mxu0 %v2038_v0 }
 0x400   :  { %1254 = vmatprep.mubr.f32.mxu1 %v2038_v0 }
 0x402   :  { %1665 = vmatmul.mubr.msk.f32.gmra.mrb[48].mxu0 %vm320_vm2, %v53_v26 }
 0x403   :  { %1670 = vmatmul.mubr.msk.f32.gmra.mrb[48].mxu1 %vm320_vm2, %v53_v26  ;;  %1366 = vmatprep.mubr.f32.mxu0 %v2038_v0 }
 0x404   :  { %1449 = vmatprep.mubr.f32.mxu1 %v2038_v0 }
 0x4c5   :  { %v1137_v30 = vpop.f32.mrb[40].mxu0 }
 0x4c6   :  { %v1138_v32 = vadd.f32 %v1137_v30, %v1036_v27  ;;  %v1232_v33 = vpop.f32.mrb[40].mxu1  ;;  %v1139_v34 = vpop.f32.mrb[41].mxu0 }
 0x4c7   :  { %v1233_v35 = vadd.f32 %v1232_v33, %v1038_v28  ;;  %v1140_v36 = vadd.f32 %v1139_v34, %v1037_v29  ;;  %v1234_v37 = vpop.f32.mrb[41].mxu1 }
 0x4c8   :  { %1923 = vtanh.f32 %v1138_v32  ;;  %v1235_v39 = vadd.f32 %v1234_v37, %v1039_v31 }
 0x4c9   :  { %1925 = vtanh.f32 %v1233_v35  ;;  %v1143_v42 = vpop.f32.mrb[42].mxu0 }
 0x4ca   :  { %1927 = vtanh.f32 %v1140_v36  ;;  %v1144_v44 = vadd.f32 %v1143_v42, %v1040_v38  ;;  %v1238_v45 = vpop.f32.mrb[42].mxu1  ;;  %v1145_v46 = vpop.f32.mrb[43].mxu0 }
 0x4cb   :  { %1929 = vtanh.f32 %v1235_v39  ;;  %v1239_v47 = vadd.f32 %v1238_v45, %v1042_v40  ;;  %v1146_v48 = vadd.f32 %v1145_v46, %v1041_v41  ;;  %v1240_v49 = vpop.f32.mrb[43].mxu1 }
 0x4cc   :  { %1931 = vtanh.f32 %v1144_v44  ;;  %v1241_v51 = vadd.f32 %v1240_v49, %v1043_v43 }
 0x4cd   :  { %1933 = vtanh.f32 %v1239_v47  ;;  %v1149_v54 = vpop.f32.mrb[44].mxu0 }
 0x4ce   :  { %1935 = vtanh.f32 %v1146_v48  ;;  %v1150_v56 = vadd.f32 %v1149_v54, %v1044_v50  ;;  %v1244_v57 = vpop.f32.mrb[44].mxu1  ;;  %v1151_v58 = vpop.f32.mrb[45].mxu0  ;;  %v54_v50 = vld [vmem:[%s2297_s0 + $0xc8] sm:$0xff]  ;;  %v56_v54 = vld [vmem:[%s2297_s0 + $0xd8] sm:$0xf] }
 0x4cf   :  { %1937 = vtanh.f32 %v1241_v51  ;;  %v1245_v59 = vadd.f32 %v1244_v57, %v1046_v52  ;;  %v1152_v60 = vadd.f32 %v1151_v58, %v1045_v53  ;;  %v1246_v61 = vpop.f32.mrb[45].mxu1  ;;  %v55_v53 = vld [vmem:[%s2297_s0 + $0xd0] sm:$0xff]  ;;  %v1282_v57 = vld [vmem:[#allocation2 + $0x328] sm:$0xff]  ;;  %s2040_s0 = smov [#allocation5]  }
 0x4d0   :  { %1939 = vtanh.f32 %v1150_v56  ;;  %v1247_v63 = vadd.f32 %v1246_v61, %v1047_v55  ;;  %v1281_v55 = vld [vmem:[#allocation2 + $0x320] sm:$0xff]  ;;  %v1283_v56 = vld [vmem:[#allocation2 + $0x330] sm:$0xff]  ;;  %s1608_s1 = sshll.u32 %s2040_s0, 4  ;;  %s1609_s1 = int_to_ptr.vmem [resolvable:$true] %s1608_s1 }
 0x4d1   :  { %1941 = vtanh.f32 %v1245_v59  ;;  %v1155_v3 = vpop.f32.mrb[46].mxu0  ;;  %v1284_v59 = vld [vmem:[#allocation2 + $0x338] sm:$0xff]  ;;  %s2009_s5 = scalar_lea.vmem %s1609_s1, 64  ;;  %p2014_p9 = scmp.lt.s32.totalorder %s1609_s1, %s1609_s1 }
 0x4d2   :  { %v1924_v5 = vpop.eup %1923  ;;  %1943 = vtanh.f32 %v1152_v60  ;;  %v1156_v6 = vadd.f32 %v1155_v3, %v1048_v62  ;;  %v1250_v7 = vpop.f32.mrb[46].mxu1  ;;  %v1285_v3 = vld [vmem:[#allocation2 + $0x340] sm:$0xff]  ;;  %p2010_p8 = scmp.ne.s32.totalorder %s1609_s1, %s2009_s5  ;;  %p2015_p10 = scmp.lt.s32.totalorder %s2009_s5, %s2009_s5 }
 0x4d3   :  { %v1157_v8 = vpop.f32.mrb[47].mxu0  ;;  %v1926_v9 = vpop.eup %1925  ;;  %1945 = vtanh.f32 %v1247_v63  ;;  %v1251_v10 = vadd.f32 %v1250_v7, %v1050_v1  ;;  %v1288_v7 = vld [vmem:[#allocation2 + $0x358] sm:$0xff] }
 0x4d4   :  { %v1158_v11 = vadd.f32 %v1157_v8, %v1049_v2  ;;  %v1252_v12 = vpop.f32.mrb[47].mxu1  ;;  %v1928_v13 = vpop.eup %1927  ;;  %1947 = vtanh.f32 %v1156_v6  ;;  %p2016_p11 = por %p2015_p10, %p2014_p9 }
 0x4d5   :  { %v1253_v14 = vadd.f32 %v1252_v12, %v1051_v4  ;;  %v1930_v16 = vpop.eup %1929  ;;  %1949 = vtanh.f32 %v1251_v10  ;;  %v1161_v17 = vpop.f32.mrb[48].mxu0 }
 0x4d6   :  { %v1932_v19 = vpop.eup %1931  ;;  %1951 = vtanh.f32 %v1158_v11  ;;  %v1256_v21 = vpop.f32.mrb[48].mxu1  ;;  %v1162_v32 = vadd.f32 %v1161_v17, %v1052_v20  ;;  %v1290_v17 = vld [vmem:[#allocation2 + $0x368] sm:$0xf]  ;;  %p2017_p12 = pnand %p2016_p11, %p2010_p8 }
 0x4d7   :  { %v1163_v22 = vpop.f32.mrb[49].mxu0  ;;  %v1934_v23 = vpop.eup %1933  ;;  %1953 = vtanh.f32 %v1253_v14  ;;  %v1743_v27 = vpack.c.bf16 %v1932_v19, %v1924_v5  ;;  %v1257_v35 = vadd.f32 %v1256_v21, %v1054_v24  ;;  %v1287_v5 = vld [vmem:[#allocation2 + $0x350] sm:$0xff]  ;;  %v1289_v14 = vld [vmem:[#allocation2 + $0x360] sm:$0xf]  ;;  %v1292_v19 = vld [vmem:[#allocation2 + $0x378] sm:$0xf] }
 0x4d8   :  { %v1164_v25 = vadd.f32 %v1163_v22, %v1053_v15  ;;  %v1258_v26 = vpop.f32.mrb[49].mxu1  ;;  %v1936_v28 = vpop.eup %1935  ;;  %v1751_v30 = vpack.c.bf16 %v1934_v23, %v1926_v9 }
 0x4d9   :  { %v1259_v29 = vadd.f32 %v1258_v26, %v1055_v18  ;;  %v1938_v31 = vpop.eup %1937  ;;  %v1741_v33 = vpack.c.bf16 %v1936_v28, %v1928_v13 }
 0x4da   :  { %v1940_v34 = vpop.eup %1939  ;;  %1955 = vtanh.f32 %v1164_v25  ;;  %v1749_v36 = vpack.c.bf16 %v1938_v31, %v1930_v16  ;;  %v1291_v16 = vld [vmem:[#allocation2 + $0x370] sm:$0xf]  ;;  %v1484_v31 = vld [vmem:[#allocation2 + $0x3e0] sm:$0xff] }
 0x4db   :  { %v1942_v37 = vpop.eup %1941  ;;  %1957 = vtanh.f32 %v1259_v29  ;;  %1742 = vmatprep.subr.bf16.mxu0 %v1741_v33  ;;  %v1482_v33 = vld [vmem:[#allocation2 + $0x3d0] sm:$0xff] }
 0x4dc   :  { %v1944_v38 = vpop.eup %1943  ;;  %1750 = vmatprep.subr.bf16.mxu1 %v1749_v36  ;;  %1744 = vmatpush1.bf16.msra.mxu0 %v1743_v27  ;;  %1959 = vtanh.f32 %v1162_v32  ;;  %v1481_v36 = vld [vmem:[#allocation2 + $0x3c8] sm:$0xff] }
 0x4dd   :  { %v1946_v39 = vpop.eup %1945  ;;  %1752 = vmatpush1.bf16.msra.mxu1 %v1751_v30  ;;  %1961 = vtanh.f32 %v1257_v35  ;;  %v1480_v30 = vld [vmem:[#allocation2 + $0x3c0] sm:$0xff] }
 0x4de   :  { %v1948_v40 = vpop.eup %1947 }
 0x4df   :  { %v1950_v41 = vpop.eup %1949  ;;  %v1747_v42 = vpack.c.bf16 %v1948_v40, %v1940_v34  ;;  %v1486_v34 = vld [vmem:[#allocation2 + $0x3f0] sm:$0xff]  ;;  %v1483_v40 = vld [vmem:[#allocation2 + $0x3d8] sm:$0xff] }
 0x4e0   :  { %v1952_v43 = vpop.eup %1951  ;;  %v1755_v44 = vpack.c.bf16 %v1950_v41, %v1942_v37  ;;  %v1485_v37 = vld [vmem:[#allocation2 + $0x3e8] sm:$0xff] }
 0x4e1   :  { %v1954_v45 = vpop.eup %1953  ;;  %v1745_v46 = vpack.c.bf16 %v1952_v43, %v1944_v38 }
 0x4e2   :  { %v1753_v47 = vpack.c.bf16 %v1954_v45, %v1946_v39 }
 0x4e3   :  { %1746 = vmatprep.subr.bf16.mxu0 %v1745_v46  ;;  %v1488_v46 = vld [vmem:[#allocation2 + $0x400] sm:$0xf] }
 0x4e4   :  { %v1956_v48 = vpop.eup %1955  ;;  %1754 = vmatprep.subr.bf16.mxu1 %v1753_v47  ;;  %1748 = vmatpush1.bf16.msra.mxu0 %v1747_v42  ;;  %v1487_v42 = vld [vmem:[#allocation2 + $0x3f8] sm:$0xff] }
 0x4e5   :  { %v1958_v49 = vpop.eup %1957  ;;  %1756 = vmatpush1.bf16.msra.mxu1 %v1755_v44  ;;  %1310 = vmatprep.subr.mxu0 %v1956_v48 }
 0x4e6   :  { %1393 = vmatprep.subr.mxu1 %v1958_v49  ;;  %v1960_v51 = vpop.eup %1959 }
 0x4e7   :  { %v1962_v52 = vpop.eup %1961 }
 0x4e8   :  { %1311 = vmatpush1.msra.mxu0 %v1960_v51  ;;  %v1490_v51 = vld [vmem:[#allocation2 + $0x410] sm:$0xf] }
 0x4e9   :  { %1394 = vmatpush1.msra.mxu1 %v1962_v52  ;;  %1671 = vmatmul.mubr.msk.f32.vlgmr.msra.gmra.mrb[50].mxu0 %vm320_vm2, %v54_v50 }
 0x4ea   :  { %1674 = vmatmul.mubr.msk.f32.vlgmr.msra.gmra.mrb[50].mxu1 %vm320_vm2, %v54_v50  ;;  %1372 = vmatprep.mubr.f32.mxu0 %v2038_v0 }
 0x4eb   :  { %1455 = vmatprep.mubr.f32.mxu1 %v2038_v0 }
 0x4ed   :  { %1672 = vmatmul.mubr.msk.f32.gmra.mrb[52].mxu0 %vm320_vm2, %v55_v53 }
 0x4ee   :  { %1675 = vmatmul.mubr.msk.f32.gmra.mrb[52].mxu1 %vm320_vm2, %v55_v53  ;;  %1378 = vmatprep.mubr.f32.mxu0 %v2038_v0 }
 0x4ef   :  { %1461 = vmatprep.mubr.f32.mxu1 %v2038_v0  ;;  %v1286_v0 = vld [vmem:[#allocation2 + $0x348] sm:$0xff] }
 0x4f1   :  { %1673 = vmatmul.mubr.msk.f32.gmra.mrb[54].mxu0 %vm320_vm2, %v56_v54 }
 0x4f2   :  { %1676 = vmatmul.mubr.msk.f32.gmra.mrb[54].mxu1 %vm320_vm2, %v56_v54 }
 0x5bc   :  { %v1368_v58 = vpop.f32.mrb[50].mxu0 }
 0x5bd   :  { %v1369_v60 = vadd.f32 %v1368_v58, %v1281_v55  ;;  %v1451_v61 = vpop.f32.mrb[50].mxu1  ;;  %v1370_v62 = vpop.f32.mrb[51].mxu0 }
 0x5be   :  { %v1452_v63 = vadd.f32 %v1451_v61, %v1283_v56  ;;  %v1371_v1 = vadd.f32 %v1370_v62, %v1282_v57  ;;  %v1453_v2 = vpop.f32.mrb[51].mxu1  ;;  %v1489_v56 = vld [vmem:[#allocation2 + $0x408] sm:$0xf] }
 0x5bf   :  { %1963 = vtanh.f32 %v1369_v60  ;;  %v1454_v4 = vadd.f32 %v1453_v2, %v1284_v59  ;;  %v1491_v60 = vld [vmem:[#allocation2 + $0x418] sm:$0xf] }
 0x5c0   :  { %1965 = vtanh.f32 %v1452_v63  ;;  %v1374_v6 = vpop.f32.mrb[52].mxu0 }
 0x5c1   :  { %1967 = vtanh.f32 %v1371_v1  ;;  %v1375_v8 = vadd.f32 %v1374_v6, %v1285_v3  ;;  %v1457_v9 = vpop.f32.mrb[52].mxu1  ;;  %v1376_v10 = vpop.f32.mrb[53].mxu0  ;;  %v1544_v1 = vlaneseq }
 0x5c2   :  { %1969 = vtanh.f32 %v1454_v4  ;;  %v1458_v11 = vadd.f32 %v1457_v9, %v1287_v5  ;;  %v1377_v12 = vadd.f32 %v1376_v10, %v1286_v0  ;;  %v1459_v13 = vpop.f32.mrb[53].mxu1 }
 0x5c3   :  { %1971 = vtanh.f32 %v1375_v8  ;;  %v1460_v15 = vadd.f32 %v1459_v13, %v1288_v7  ;;  %vm1599_vm4 = vcmp.lt.s32.totalorder %v1544_v1, 512 }
 0x5c4   :  { %1973 = vtanh.f32 %v1458_v11  ;;  %v1380_v18 = vpop.f32.mrb[54].mxu0 }
 0x5c5   :  { %1975 = vtanh.f32 %v1377_v12  ;;  %v1381_v20 = vadd.f32 %v1380_v18, %v1289_v14  ;;  %v1463_v21 = vpop.f32.mrb[54].mxu1  ;;  %v1382_v22 = vpop.f32.mrb[55].mxu0  ;;  %v1545_v12 = vshrl.u32 %v1544_v1, 7 }
 0x5c6   :  { %1977 = vtanh.f32 %v1460_v15  ;;  %v1464_v23 = vadd.f32 %v1463_v21, %v1291_v16  ;;  %v1383_v24 = vadd.f32 %v1382_v22, %v1290_v17  ;;  %v1465_v25 = vpop.f32.mrb[55].mxu1 }
 0x5c7   :  { %1979 = vtanh.f32 %v1381_v20  ;;  %v1466_v26 = vadd.f32 %v1465_v25, %v1292_v19  ;;  %v1546_v21 = vsub.s32 0, %v1545_v12  ;;  %v1554_v25 = vsub.s32 2, %v1545_v12 }
 0x5c8   :  { %1981 = vtanh.f32 %v1464_v23 }
 0x5c9   :  { %v1964_v27 = vpop.eup %1963  ;;  %1983 = vtanh.f32 %v1383_v24  ;;  %v1493_v24 = vld [vmem:[#allocation2 + $0x404] ss:$8 sm:$0xf] }
 0x5ca   :  { %v1966_v28 = vpop.eup %1965  ;;  %1985 = vtanh.f32 %v1466_v26  ;;  %v1494_v39 = vmul.f32 %v1964_v27, %v1480_v30 }
 0x5cb   :  { %v1968_v29 = vpop.eup %1967  ;;  %v1496_v44 = vmul.f32 %v1966_v28, %v1482_v33  ;;  %v1550_v28 = vsub.s32 1, %v1545_v12  ;;  %v1558_v33 = vsub.s32 3, %v1545_v12 }
 0x5cc   :  { %v1970_v32 = vpop.eup %1969  ;;  %v1495_v48 = vmul.f32 %v1968_v29, %v1481_v36  ;;  %v2039_v29 = vmov 1966171168   ;;  %v1547_v36 = vrot.slane %v1493_v24, %v1546_v21 }
 0x5cd   :  { %v1972_v35 = vpop.eup %1971  ;;  %v1497_v53 = vmul.f32 %v1970_v32, %v1483_v40  ;;  %v1575_v30 = vunpack.c.l.s4 %v2039_v29 }
 0x5ce   :  { %v1974_v38 = vpop.eup %1973  ;;  %v1498_v41 = vmul.f32 %v1972_v35, %v1484_v31 }
 0x5cf   :  { %v1976_v43 = vpop.eup %1975  ;;  %v1500_v45 = vmul.f32 %v1974_v38, %v1486_v34 }
 0x5d0   :  { %v1978_v47 = vpop.eup %1977  ;;  %v1506_v49 = vadd.f32 %v1498_v41, %v1494_v39  ;;  %v1499_v50 = vmul.f32 %v1976_v43, %v1485_v37  ;;  %v1555_v39 = vrot.slane %v1493_v24, %v1554_v25  ;;  %v1576_v43 = vunpack.c.0.s8 %v1575_v30 }
 0x5d1   :  { %v1980_v52 = vpop.eup %1979  ;;  %v1525_v54 = vadd.f32 %v1500_v45, %v1496_v44  ;;  %v1501_v55 = vmul.f32 %v1978_v47, %v1487_v42  ;;  %v1551_v42 = vrot.slane %v1493_v24, %v1550_v28 }
 0x5d2   :  { %v1982_v57 = vpop.eup %1981  ;;  %v1516_v58 = vadd.f32 %v1499_v50, %v1495_v48  ;;  %v1502_v59 = vmul.f32 %v1980_v52, %v1488_v46  ;;  %v1559_v46 = vrot.slane %v1493_v24, %v1558_v33  ;;  %v1579_v52 = vsub.s32 %v1576_v43, %v1545_v12 }
 0x5d3   :  { %v1984_v61 = vpop.eup %1983  ;;  %v1534_v62 = vadd.f32 %v1501_v55, %v1497_v53  ;;  %v1504_v63 = vmul.f32 %v1982_v57, %v1490_v51 }
 0x5d4   :  { %v1986_v2 = vpop.eup %1985  ;;  %v1508_v3 = vsel %vm1507_vm3, %v1502_v59, 0.0  ;;  %v1503_v4 = vmul.f32 %v1984_v61, %v1489_v56 }
 0x5d5   :  { %v1509_v5 = vadd.f32 %v1508_v3, %v1506_v49  ;;  %v1526_v0 = vsel %vm1507_vm3, %v1504_v63, 0.0  ;;  %v1505_v6 = vmul.f32 %v1986_v2, %v1491_v60 }
 0x5d6   :  { %v1527_v7 = vadd.f32 %v1526_v0, %v1525_v54  ;;  %v1517_v8 = vsel %vm1507_vm3, %v1503_v4, 0.0 }
 0x5d7   :  { %v1510_v9 = vrot.slane %v1509_v5, 4  ;;  %v1518_v10 = vadd.f32 %v1517_v8, %v1516_v58  ;;  %v1535_v11 = vsel %vm1507_vm3, %v1505_v6, 0.0 }
 0x5d8   :  { %v1528_v13 = vrot.slane %v1527_v7, 4  ;;  %v1536_v14 = vadd.f32 %v1535_v11, %v1534_v62 }
 0x5d9   :  { %v1511_v15 = vadd.f32 %v1510_v9, %v1509_v5  ;;  %v1519_v16 = vrot.slane %v1518_v10, 4 }
 0x5da   :  { %v1529_v17 = vadd.f32 %v1528_v13, %v1527_v7  ;;  %v1537_v18 = vrot.slane %v1536_v14, 4 }
 0x5db   :  { %v1512_v19 = vrot.slane %v1511_v15, 2  ;;  %v1520_v20 = vadd.f32 %v1519_v16, %v1518_v10 }
 0x5dc   :  { %v1530_v22 = vrot.slane %v1529_v17, 2  ;;  %v1538_v23 = vadd.f32 %v1537_v18, %v1536_v14 }
 0x5dd   :  { %v1521_v26 = vrot.slane %v1520_v20, 2  ;;  %v1513_v27 = vadd.f32 %v1512_v19, %v1511_v15 }
 0x5de   :  { %v1539_v31 = vrot.slane %v1538_v23, 2  ;;  %v1531_v32 = vadd.f32 %v1530_v22, %v1529_v17 }
 0x5df   :  { %v1514_v34 = vrot.slane %v1513_v27, 1  ;;  %v1522_v35 = vadd.f32 %v1521_v26, %v1520_v20 }
 0x5e0   :  { %v1532_v37 = vrot.slane %v1531_v32, 1  ;;  %v1540_v38 = vadd.f32 %v1539_v31, %v1538_v23 }
 0x5e1   :  { %v1515_v40 = vadd.f32 %v1514_v34, %v1513_v27  ;;  %v1523_v41 = vrot.slane %v1522_v35, 1 }
 0x5e2   :  { %v1533_v44 = vadd.f32 %v1532_v37, %v1531_v32  ;;  %v1541_v45 = vrot.slane %v1540_v38, 1 }
 0x5e3   :  { %v1524_v47 = vadd.f32 %v1523_v41, %v1522_v35  ;;  %v1564_v48 = vadd.f32 %v1547_v36, %v1515_v40 }
 0x5e4   :  { %v1542_v49 = vadd.f32 %v1541_v45, %v1540_v38  ;;  %v1566_v50 = vadd.f32 %v1555_v39, %v1533_v44 }
 0x5e5   :  { %v1565_v51 = vadd.f32 %v1551_v42, %v1524_v47 }
 0x5e6   :  { %v1567_v53 = vadd.f32 %v1559_v46, %v1542_v49 }
 0x5e7   :  { %v1572_v54 = vcombine.low %v1564_v48, %v1565_v51 }
 0x5e8   :  { %v1573_v55 = vcombine.low %v1566_v50, %v1567_v53 }
 0x5e9   :  { %v1580_v56 = vrot.slane %v1572_v54, %v1579_v52 }
 0x5ea   :  { %v1587_v57 = vrot.slane %v1573_v55, %v1579_v52 }
 0x5ec   :  { %v1588_v58 = vcombine.low %v1580_v56, %v1587_v57 }
 0x5ee   :  { %v1595_v59 = vrot.slane %v1588_v58, %v1579_v52 }
 0x5f0   :  { %1601 = vst.msk [vmem:[#allocation5] sm:$0xf] %vm1599_vm4, %v1595_v59 }
 0x5f1   :  { %2020 = shalt.err (!%p2017_p12)
}
 0x5f2   :  { %s2021_s8 = scalar_lea.hbm %s2300_s3, 64 }
 0x5f3   :  { %p2022_p13 = scmp.ne.s32.totalorder %s2300_s3, %s2021_s8  ;;  %p2025_p0 = scmp.lt.u32.totalorder %s2021_s8, %s2300_s3 }
 0x5f5   :  { %p2027_p1 = pnand %p2025_p0, %p2022_p13 }
 0x5f7   :  { %2030 = shalt.err (!%p2027_p1)
}
 0x5f8   :  { %1611 = dma.vmem_to_hbm [thread:$0]  %s1609_s1, 64, %s2300_s3, [#allocation4]  }
 0x5f9   :  { %2033 = dma.done.wait [#allocation4], 64  }
 0x5fa   :  { %2034 = vsyncadd [#allocation4], 4294967232 }
 0x5fb   :  { %1615 = vsyncpa [#allocation3], 1 }
 0x5fc   :  { %1616 = vsyncpa [#allocation4], 1 }

</bundles_post_ra>
